<compile_context>
chip_gen: v6e
topology: v6e:2x2x1
jax: 0.10.0
libtpu: 0.0.40
codegen_flags: <defaults>
</compile_context>

<pallas_src>
import jax
import jax.numpy as jnp
import numpy as np
from jax.experimental import pallas as pl
from jax.experimental.pallas import tpu as pltpu

C_OUT = 128            # conv1 output channels
K = 3                  # conv kernel size
HW = 3                 # tic-tac-toe board is 3x3
NPOS = HW * HW         # 9 conv output positions (== 9 input pixels)
XCOLS = NPOS + 1       # 9 pixels + constant-ones column (folded conv bias)
FLAT = C_OUT * NPOS    # 1152
LANE = 128
NCHUNK = FLAT // LANE  # 9 chunks of 128 columns
HIDDEN = 32            # "hidden" argument of RepresentationsNet


# ---------------------------------------------------------------------------
# Kernel: fused (conv-as-matmul -> relu -> fc) over 128-column chunks.
# ---------------------------------------------------------------------------
def repr_kernel(x_ref, w2_ref, fwt_ref, fb_ref, out_ref):
    """x_ref:   (TB, 10)      flattened boards (j = ih*3+iw) + ones column
       w2_ref:  (10, 1152)    folded conv weight; row 9 = conv bias; cols c*9+pos
       fwt_ref: (1152, OUTW)  fc weight transposed, lane-padded to mult. of 128
       fb_ref:  (1, OUTW)     fc bias, lane-padded, f32
       out_ref: (TB, OUTW)
    """
    cdt = w2_ref.dtype
    x = x_ref[...].astype(cdt)                      # (TB, 10); cast for MXU dtype
    acc = jnp.broadcast_to(fb_ref[...], out_ref.shape)   # f32 accumulator init

    # Static, unrolled fusion over the 1152 (=9*128) dimension: the (TB, 1152)
    # intermediate never materializes in VMEM.
    for c in range(NCHUNK):
        h = jnp.dot(x, w2_ref[:, c * LANE:(c + 1) * LANE],
                    preferred_element_type=jnp.float32)          # (TB, 128)
        h = jnp.maximum(h, 0.0).astype(cdt)                      # ReLU
        acc = acc + jnp.dot(h, fwt_ref[c * LANE:(c + 1) * LANE, :],
                            preferred_element_type=jnp.float32)  # (TB, OUTW)

    out_ref[...] = acc


# ---------------------------------------------------------------------------
# One-time parameter preparation (hoisted out of the per-forward path).
# ---------------------------------------------------------------------------
def _selection_tensor():
    """sel[pos, k, j] = 1 if conv output position pos with kernel offset k reads
    input pixel j (zero otherwise, i.e. the zero-padding region)."""
    sel = np.zeros((NPOS, K * K, NPOS), np.float32)
    for oh in range(HW):
        for ow in range(HW):
            pos = oh * HW + ow
            for kh in range(K):
                for kw in range(K):
                    ih, iw = oh + kh - 1, ow + kw - 1
                    if 0 <= ih < HW and 0 <= iw < HW:
                        sel[pos, kh * K + kw, ih * HW + iw] = 1.0
    return jnp.asarray(sel)


def prepare_params(conv_w, conv_b, fc_w, fc_b, compute_dtype=jnp.float32):
    """Fold conv (zero padding, in_channels=1) + conv bias + NCHW flatten into a
    single (10, 1152) matrix; transpose + lane-pad fc weight/bias.  Call ONCE.
    compute_dtype=jnp.bfloat16 enables the bf16 MXU path (v6e/v7x)."""
    conv_w = conv_w.astype(jnp.float32)
    conv_b = conv_b.astype(jnp.float32)
    fc_w = fc_w.astype(jnp.float32)
    fc_b = fc_b.astype(jnp.float32)
    hidden = fc_w.shape[0]
    out_w = ((hidden + LANE - 1) // LANE) * LANE     # lane-dense output width

    sel = _selection_tensor()                        # (pos, k, j)
    cw = conv_w.reshape(C_OUT, K * K)                # (c, k)
    # W2[j, c*9 + pos] = sum_k sel[pos, k, j] * cw[c, k]
    w2 = jnp.einsum("pkj,ck->jcp", sel, cw).reshape(NPOS, FLAT)
    b2 = jnp.repeat(conv_b, NPOS).reshape(1, FLAT)   # conv bias in c*9+pos order
    w2 = jnp.concatenate([w2, b2], axis=0)           # (10, 1152); row 9 = bias

    fwt = jnp.zeros((FLAT, out_w), jnp.float32).at[:, :hidden].set(fc_w.T)
    fb = jnp.zeros((1, out_w), jnp.float32).at[:, :hidden].set(
        fc_b.reshape(1, hidden))
    return w2.astype(compute_dtype), fwt.astype(compute_dtype), fb, hidden


# ---------------------------------------------------------------------------
# Forward: flatten boards, append ones column, one pallas_call over batch tiles.
# ---------------------------------------------------------------------------
def representations_net(x, params, tb=2048):
    """x: (B,1,3,3) or (1,3,3). params: output of prepare_params."""
    w2, fwt, fb, hidden = params
    out_w = fwt.shape[1]

    x = x.astype(jnp.float32)
    if x.ndim == 3:                      # mirror PyTorch's unsqueeze(0)
        x = x[None]
    B = x.shape[0]

    # Flatten board (j = ih*3+iw), append the ones column (folded conv bias),
    # and round the batch up to a multiple of 8 sublanes -- one small pad op.
    b_aligned = ((B + 7) // 8) * 8
    xf = jnp.pad(x.reshape(B, NPOS), ((0, b_aligned - B), (0, 1)),
                 constant_values=1.0)    # (b_aligned, 10)

    # Batch tile: at most ~half the batch (>= 2 grid steps so v7x's two
    # TensorCores both get work), multiple of 8, capped by tb.
    half = (((b_aligned + 1) // 2) + 7) // 8 * 8
    tb_eff = max(8, min(tb, half))
    grid = (pl.cdiv(b_aligned, tb_eff),)   # partial last block handled by Pallas

    out = pl.pallas_call(
        repr_kernel,
        out_shape=jax.ShapeDtypeStruct((b_aligned, out_w), jnp.float32),
        grid_spec=pltpu.PrefetchScalarGridSpec(
            num_scalar_prefetch=0,
            grid=grid,
            in_specs=[
                pl.BlockSpec((tb_eff, XCOLS), lambda i: (i, 0)),   # boards+ones
                pl.BlockSpec((XCOLS, FLAT), lambda i: (0, 0)),     # W2 (resident)
                pl.BlockSpec((FLAT, out_w), lambda i: (0, 0)),     # fc_w.T padded
                pl.BlockSpec((1, out_w), lambda i: (0, 0)),        # fc bias padded
            ],
            out_specs=pl.BlockSpec((tb_eff, out_w), lambda i: (i, 0)),
        ),
        compiler_params=pltpu.CompilerParams(
            dimension_semantics=("parallel",),
            vmem_limit_bytes=48 * 1024 * 1024),
    )(xf, w2, fwt, fb)

    return out[:B, :hidden]


# ---------------------------------------------------------------------------
# Pure-JAX reference matching the PyTorch forward exactly.
# ---------------------------------------------------------------------------
def reference(x, conv_w, conv_b, fc_w, fc_b):
    if x.ndim == 3:
        x = x[None]
    y = jax.lax.conv_general_dilated(
        x.astype(jnp.float32), conv_w, window_strides=(1, 1),
        padding=((1, 1), (1, 1)), dimension_numbers=("NCHW", "OIHW", "NCHW"))
    y = jax.nn.relu(y + conv_b.reshape(1, -1, 1, 1))
    y = y.reshape(y.shape[0], -1)                        # NCHW flatten: c*9 + pos
    return y @ fc_w.T + fc_b


if __name__ == "__main__":
    key = jax.random.PRNGKey(0)
    k_x, k_cw, k_cb, k_fw, k_fb = jax.random.split(key, 5)

    # Deterministic synthetic parameters (shapes from the module __init__).
    conv_w = 0.10 * jax.random.normal(k_cw, (C_OUT, 1, K, K), dtype=jnp.float32)
    conv_b = 0.10 * jax.random.normal(k_cb, (C_OUT,), dtype=jnp.float32)
    fc_w = 0.05 * jax.random.normal(k_fw, (HIDDEN, FLAT), dtype=jnp.float32)
    fc_b = 0.05 * jax.random.normal(k_fb, (HIDDEN,), dtype=jnp.float32)

    # One-time weight folding / re-layout (hoisted out of the forward path).
    params = jax.block_until_ready(prepare_params(conv_w, conv_b, fc_w, fc_b))

    # 1) Small-batch check (B=2).
    B = 2
    x = jax.random.normal(k_x, (B, 1, HW, HW), dtype=jnp.float32)
    out = jax.block_until_ready(representations_net(x, params))
    ref = jax.block_until_ready(reference(x, conv_w, conv_b, fc_w, fc_b))
    assert out.shape == (B, HIDDEN)
    err = float(jnp.max(jnp.abs(out - ref)))
    assert jnp.allclose(out, ref, atol=5e-3, rtol=5e-3), f"f32 B=2 max err {err}"

    # 2) Single-board (3,3,3-D input) unsqueeze path.
    x1 = jax.random.normal(k_x, (1, HW, HW), dtype=jnp.float32)
    out1 = jax.block_until_ready(representations_net(x1, params))
    ref1 = jax.block_until_ready(reference(x1, conv_w, conv_b, fc_w, fc_b))
    assert out1.shape == (1, HIDDEN)
    assert jnp.allclose(out1, ref1, atol=5e-3, rtol=5e-3), "unsqueeze path"

    # 3) Multi-step grid with a partial last block (B=20 -> 24 rows, tile 16).
    B2 = 20
    x2 = jax.random.normal(k_x, (B2, 1, HW, HW), dtype=jnp.float32)
    out2 = jax.block_until_ready(representations_net(x2, params))
    ref2 = jax.block_until_ready(reference(x2, conv_w, conv_b, fc_w, fc_b))
    assert out2.shape == (B2, HIDDEN)
    err2 = float(jnp.max(jnp.abs(out2 - ref2)))
    assert jnp.allclose(out2, ref2, atol=5e-3, rtol=5e-3), f"partial-block err {err2}"

    # 4) Optional bf16 MXU path (v6e/v7x); f32 accumulation, looser tolerance.
    params_bf16 = jax.block_until_ready(
        prepare_params(conv_w, conv_b, fc_w, fc_b, compute_dtype=jnp.bfloat16))
    B3 = 16
    x3 = jax.random.normal(k_x, (B3, 1, HW, HW), dtype=jnp.float32)
    out3 = jax.block_until_ready(representations_net(x3, params_bf16))
    ref3 = jax.block_until_ready(reference(x3, conv_w, conv_b, fc_w, fc_b))
    assert out3.shape == (B3, HIDDEN)
    err3 = float(jnp.max(jnp.abs(out3 - ref3)))
    assert jnp.allclose(out3, ref3, atol=5e-2, rtol=5e-2), f"bf16 max err {err3}"

    print("KERNEL_OK")
</pallas_src>

<mosaic_0001>
module attributes {stable_mosaic.version = 11 : i64} {
  func.func @repr_kernel(%arg0: i32, %arg1: memref<8x10xf32, #tpu.memory_space<vmem>>, %arg2: memref<10x1152xf32, #tpu.memory_space<vmem>>, %arg3: memref<1152x128xf32, #tpu.memory_space<vmem>>, %arg4: memref<1x128xf32, #tpu.memory_space<vmem>>, %arg5: memref<8x128xf32, #tpu.memory_space<vmem>>) attributes {dimension_semantics = [#tpu.dimension_semantics<parallel>], iteration_bounds = array<i64: 1>, scalar_prefetch = 0 : i64, scratch_operands = 0 : i64, tpu.core_type = #tpu.core_type<tc>, window_params = [{transform_indices = @transform_0, window_bounds = array<i64: 8, 10>}, {pipeline_mode = #tpu.pipeline_mode<synchronous>, transform_indices = @transform_1, window_bounds = array<i64: 10, 1152>}, {pipeline_mode = #tpu.pipeline_mode<synchronous>, transform_indices = @transform_2, window_bounds = array<i64: 1152, 128>}, {pipeline_mode = #tpu.pipeline_mode<synchronous>, transform_indices = @transform_3, window_bounds = array<i64: 1, 128>}, {transform_indices = @transform_4, window_bounds = array<i64: 8, 128>}]} {
    %c0 = arith.constant 0 : index
    %c0_0 = arith.constant 0 : index
    %0 = vector.load %arg1[%c0, %c0_0] : memref<8x10xf32, #tpu.memory_space<vmem>>, vector<8x10xf32>
    %c0_1 = arith.constant 0 : index
    %c0_2 = arith.constant 0 : index
    %1 = vector.load %arg4[%c0_1, %c0_2] : memref<1x128xf32, #tpu.memory_space<vmem>>, vector<1x128xf32>
    %2 = vector.shape_cast %1 : vector<1x128xf32> to vector<1x128xf32>
    %3 = vector.broadcast %2 : vector<1x128xf32> to vector<8x128xf32>
    %c0_3 = arith.constant 0 : index
    %c0_4 = arith.constant 0 : index
    %4 = vector.load %arg2[%c0_3, %c0_4] : memref<10x1152xf32, #tpu.memory_space<vmem>>, vector<10x128xf32>
    %cst = arith.constant dense<0.000000e+00> : vector<8x128xf32>
    %5 = tpu.matmul %0, %4, %cst {dimension_numbers = #tpu.dot_dimension_numbers<[1], [0], [0], [1], [0, 0, 1, 1], [], []>} : vector<8x10xf32>, vector<10x128xf32>, vector<8x128xf32> -> vector<8x128xf32>
    %cst_5 = arith.constant 0.000000e+00 : f32
    %6 = vector.broadcast %cst_5 : f32 to vector<8x128xf32>
    %7 = arith.maximumf %5, %6 : vector<8x128xf32>
    %c0_6 = arith.constant 0 : index
    %c0_7 = arith.constant 0 : index
    %8 = vector.load %arg3[%c0_6, %c0_7] : memref<1152x128xf32, #tpu.memory_space<vmem>>, vector<128x128xf32>
    %cst_8 = arith.constant dense<0.000000e+00> : vector<8x128xf32>
    %9 = tpu.matmul %7, %8, %cst_8 {dimension_numbers = #tpu.dot_dimension_numbers<[1], [0], [0], [1], [0, 0, 1, 1], [], []>} : vector<8x128xf32>, vector<128x128xf32>, vector<8x128xf32> -> vector<8x128xf32>
    %10 = arith.addf %3, %9 : vector<8x128xf32>
    %c0_9 = arith.constant 0 : index
    %c128 = arith.constant 128 : index
    %11 = vector.load %arg2[%c0_9, %c128] : memref<10x1152xf32, #tpu.memory_space<vmem>>, vector<10x128xf32>
    %cst_10 = arith.constant dense<0.000000e+00> : vector<8x128xf32>
    %12 = tpu.matmul %0, %11, %cst_10 {dimension_numbers = #tpu.dot_dimension_numbers<[1], [0], [0], [1], [0, 0, 1, 1], [], []>} : vector<8x10xf32>, vector<10x128xf32>, vector<8x128xf32> -> vector<8x128xf32>
    %cst_11 = arith.constant 0.000000e+00 : f32
    %13 = vector.broadcast %cst_11 : f32 to vector<8x128xf32>
    %14 = arith.maximumf %12, %13 : vector<8x128xf32>
    %c128_12 = arith.constant 128 : index
    %c0_13 = arith.constant 0 : index
    %15 = vector.load %arg3[%c128_12, %c0_13] : memref<1152x128xf32, #tpu.memory_space<vmem>>, vector<128x128xf32>
    %cst_14 = arith.constant dense<0.000000e+00> : vector<8x128xf32>
    %16 = tpu.matmul %14, %15, %cst_14 {dimension_numbers = #tpu.dot_dimension_numbers<[1], [0], [0], [1], [0, 0, 1, 1], [], []>} : vector<8x128xf32>, vector<128x128xf32>, vector<8x128xf32> -> vector<8x128xf32>
    %17 = arith.addf %10, %16 : vector<8x128xf32>
    %c0_15 = arith.constant 0 : index
    %c256 = arith.constant 256 : index
    %18 = vector.load %arg2[%c0_15, %c256] : memref<10x1152xf32, #tpu.memory_space<vmem>>, vector<10x128xf32>
    %cst_16 = arith.constant dense<0.000000e+00> : vector<8x128xf32>
    %19 = tpu.matmul %0, %18, %cst_16 {dimension_numbers = #tpu.dot_dimension_numbers<[1], [0], [0], [1], [0, 0, 1, 1], [], []>} : vector<8x10xf32>, vector<10x128xf32>, vector<8x128xf32> -> vector<8x128xf32>
    %cst_17 = arith.constant 0.000000e+00 : f32
    %20 = vector.broadcast %cst_17 : f32 to vector<8x128xf32>
    %21 = arith.maximumf %19, %20 : vector<8x128xf32>
    %c256_18 = arith.constant 256 : index
    %c0_19 = arith.constant 0 : index
    %22 = vector.load %arg3[%c256_18, %c0_19] : memref<1152x128xf32, #tpu.memory_space<vmem>>, vector<128x128xf32>
    %cst_20 = arith.constant dense<0.000000e+00> : vector<8x128xf32>
    %23 = tpu.matmul %21, %22, %cst_20 {dimension_numbers = #tpu.dot_dimension_numbers<[1], [0], [0], [1], [0, 0, 1, 1], [], []>} : vector<8x128xf32>, vector<128x128xf32>, vector<8x128xf32> -> vector<8x128xf32>
    %24 = arith.addf %17, %23 : vector<8x128xf32>
    %c0_21 = arith.constant 0 : index
    %c384 = arith.constant 384 : index
    %25 = vector.load %arg2[%c0_21, %c384] : memref<10x1152xf32, #tpu.memory_space<vmem>>, vector<10x128xf32>
    %cst_22 = arith.constant dense<0.000000e+00> : vector<8x128xf32>
    %26 = tpu.matmul %0, %25, %cst_22 {dimension_numbers = #tpu.dot_dimension_numbers<[1], [0], [0], [1], [0, 0, 1, 1], [], []>} : vector<8x10xf32>, vector<10x128xf32>, vector<8x128xf32> -> vector<8x128xf32>
    %cst_23 = arith.constant 0.000000e+00 : f32
    %27 = vector.broadcast %cst_23 : f32 to vector<8x128xf32>
    %28 = arith.maximumf %26, %27 : vector<8x128xf32>
    %c384_24 = arith.constant 384 : index
    %c0_25 = arith.constant 0 : index
    %29 = vector.load %arg3[%c384_24, %c0_25] : memref<1152x128xf32, #tpu.memory_space<vmem>>, vector<128x128xf32>
    %cst_26 = arith.constant dense<0.000000e+00> : vector<8x128xf32>
    %30 = tpu.matmul %28, %29, %cst_26 {dimension_numbers = #tpu.dot_dimension_numbers<[1], [0], [0], [1], [0, 0, 1, 1], [], []>} : vector<8x128xf32>, vector<128x128xf32>, vector<8x128xf32> -> vector<8x128xf32>
    %31 = arith.addf %24, %30 : vector<8x128xf32>
    %c0_27 = arith.constant 0 : index
    %c512 = arith.constant 512 : index
    %32 = vector.load %arg2[%c0_27, %c512] : memref<10x1152xf32, #tpu.memory_space<vmem>>, vector<10x128xf32>
    %cst_28 = arith.constant dense<0.000000e+00> : vector<8x128xf32>
    %33 = tpu.matmul %0, %32, %cst_28 {dimension_numbers = #tpu.dot_dimension_numbers<[1], [0], [0], [1], [0, 0, 1, 1], [], []>} : vector<8x10xf32>, vector<10x128xf32>, vector<8x128xf32> -> vector<8x128xf32>
    %cst_29 = arith.constant 0.000000e+00 : f32
    %34 = vector.broadcast %cst_29 : f32 to vector<8x128xf32>
    %35 = arith.maximumf %33, %34 : vector<8x128xf32>
    %c512_30 = arith.constant 512 : index
    %c0_31 = arith.constant 0 : index
    %36 = vector.load %arg3[%c512_30, %c0_31] : memref<1152x128xf32, #tpu.memory_space<vmem>>, vector<128x128xf32>
    %cst_32 = arith.constant dense<0.000000e+00> : vector<8x128xf32>
    %37 = tpu.matmul %35, %36, %cst_32 {dimension_numbers = #tpu.dot_dimension_numbers<[1], [0], [0], [1], [0, 0, 1, 1], [], []>} : vector<8x128xf32>, vector<128x128xf32>, vector<8x128xf32> -> vector<8x128xf32>
    %38 = arith.addf %31, %37 : vector<8x128xf32>
    %c0_33 = arith.constant 0 : index
    %c640 = arith.constant 640 : index
    %39 = vector.load %arg2[%c0_33, %c640] : memref<10x1152xf32, #tpu.memory_space<vmem>>, vector<10x128xf32>
    %cst_34 = arith.constant dense<0.000000e+00> : vector<8x128xf32>
    %40 = tpu.matmul %0, %39, %cst_34 {dimension_numbers = #tpu.dot_dimension_numbers<[1], [0], [0], [1], [0, 0, 1, 1], [], []>} : vector<8x10xf32>, vector<10x128xf32>, vector<8x128xf32> -> vector<8x128xf32>
    %cst_35 = arith.constant 0.000000e+00 : f32
    %41 = vector.broadcast %cst_35 : f32 to vector<8x128xf32>
    %42 = arith.maximumf %40, %41 : vector<8x128xf32>
    %c640_36 = arith.constant 640 : index
    %c0_37 = arith.constant 0 : index
    %43 = vector.load %arg3[%c640_36, %c0_37] : memref<1152x128xf32, #tpu.memory_space<vmem>>, vector<128x128xf32>
    %cst_38 = arith.constant dense<0.000000e+00> : vector<8x128xf32>
    %44 = tpu.matmul %42, %43, %cst_38 {dimension_numbers = #tpu.dot_dimension_numbers<[1], [0], [0], [1], [0, 0, 1, 1], [], []>} : vector<8x128xf32>, vector<128x128xf32>, vector<8x128xf32> -> vector<8x128xf32>
    %45 = arith.addf %38, %44 : vector<8x128xf32>
    %c0_39 = arith.constant 0 : index
    %c768 = arith.constant 768 : index
    %46 = vector.load %arg2[%c0_39, %c768] : memref<10x1152xf32, #tpu.memory_space<vmem>>, vector<10x128xf32>
    %cst_40 = arith.constant dense<0.000000e+00> : vector<8x128xf32>
    %47 = tpu.matmul %0, %46, %cst_40 {dimension_numbers = #tpu.dot_dimension_numbers<[1], [0], [0], [1], [0, 0, 1, 1], [], []>} : vector<8x10xf32>, vector<10x128xf32>, vector<8x128xf32> -> vector<8x128xf32>
    %cst_41 = arith.constant 0.000000e+00 : f32
    %48 = vector.broadcast %cst_41 : f32 to vector<8x128xf32>
    %49 = arith.maximumf %47, %48 : vector<8x128xf32>
    %c768_42 = arith.constant 768 : index
    %c0_43 = arith.constant 0 : index
    %50 = vector.load %arg3[%c768_42, %c0_43] : memref<1152x128xf32, #tpu.memory_space<vmem>>, vector<128x128xf32>
    %cst_44 = arith.constant dense<0.000000e+00> : vector<8x128xf32>
    %51 = tpu.matmul %49, %50, %cst_44 {dimension_numbers = #tpu.dot_dimension_numbers<[1], [0], [0], [1], [0, 0, 1, 1], [], []>} : vector<8x128xf32>, vector<128x128xf32>, vector<8x128xf32> -> vector<8x128xf32>
    %52 = arith.addf %45, %51 : vector<8x128xf32>
    %c0_45 = arith.constant 0 : index
    %c896 = arith.constant 896 : index
    %53 = vector.load %arg2[%c0_45, %c896] : memref<10x1152xf32, #tpu.memory_space<vmem>>, vector<10x128xf32>
    %cst_46 = arith.constant dense<0.000000e+00> : vector<8x128xf32>
    %54 = tpu.matmul %0, %53, %cst_46 {dimension_numbers = #tpu.dot_dimension_numbers<[1], [0], [0], [1], [0, 0, 1, 1], [], []>} : vector<8x10xf32>, vector<10x128xf32>, vector<8x128xf32> -> vector<8x128xf32>
    %cst_47 = arith.constant 0.000000e+00 : f32
    %55 = vector.broadcast %cst_47 : f32 to vector<8x128xf32>
    %56 = arith.maximumf %54, %55 : vector<8x128xf32>
    %c896_48 = arith.constant 896 : index
    %c0_49 = arith.constant 0 : index
    %57 = vector.load %arg3[%c896_48, %c0_49] : memref<1152x128xf32, #tpu.memory_space<vmem>>, vector<128x128xf32>
    %cst_50 = arith.constant dense<0.000000e+00> : vector<8x128xf32>
    %58 = tpu.matmul %56, %57, %cst_50 {dimension_numbers = #tpu.dot_dimension_numbers<[1], [0], [0], [1], [0, 0, 1, 1], [], []>} : vector<8x128xf32>, vector<128x128xf32>, vector<8x128xf32> -> vector<8x128xf32>
    %59 = arith.addf %52, %58 : vector<8x128xf32>
    %c0_51 = arith.constant 0 : index
    %c1024 = arith.constant 1024 : index
    %60 = vector.load %arg2[%c0_51, %c1024] : memref<10x1152xf32, #tpu.memory_space<vmem>>, vector<10x128xf32>
    %cst_52 = arith.constant dense<0.000000e+00> : vector<8x128xf32>
    %61 = tpu.matmul %0, %60, %cst_52 {dimension_numbers = #tpu.dot_dimension_numbers<[1], [0], [0], [1], [0, 0, 1, 1], [], []>} : vector<8x10xf32>, vector<10x128xf32>, vector<8x128xf32> -> vector<8x128xf32>
    %cst_53 = arith.constant 0.000000e+00 : f32
    %62 = vector.broadcast %cst_53 : f32 to vector<8x128xf32>
    %63 = arith.maximumf %61, %62 : vector<8x128xf32>
    %c1024_54 = arith.constant 1024 : index
    %c0_55 = arith.constant 0 : index
    %64 = vector.load %arg3[%c1024_54, %c0_55] : memref<1152x128xf32, #tpu.memory_space<vmem>>, vector<128x128xf32>
    %cst_56 = arith.constant dense<0.000000e+00> : vector<8x128xf32>
    %65 = tpu.matmul %63, %64, %cst_56 {dimension_numbers = #tpu.dot_dimension_numbers<[1], [0], [0], [1], [0, 0, 1, 1], [], []>} : vector<8x128xf32>, vector<128x128xf32>, vector<8x128xf32> -> vector<8x128xf32>
    %66 = arith.addf %59, %65 : vector<8x128xf32>
    %c0_57 = arith.constant 0 : index
    %c0_58 = arith.constant 0 : index
    %67 = vector.load %arg5[%c0_57, %c0_58] : memref<8x128xf32, #tpu.memory_space<vmem>>, vector<8x128xf32>
    tpu.vector_store %arg5[%c0_57, %c0_58], %66 {strides = array<i32>} : memref<8x128xf32, #tpu.memory_space<vmem>>, vector<8x128xf32>,
    return
  }
  func.func @transform_0(%arg0: i32) -> (i32, i32) {
    %c0_i32 = arith.constant 0 : i32
    %c0_i32_0 = arith.constant 0 : i32
    return %arg0, %c0_i32 : i32, i32
  }
  func.func @transform_1(%arg0: i32) -> (i32, i32) {
    %c0_i32 = arith.constant 0 : i32
    %c0_i32_0 = arith.constant 0 : i32
    %c0_i32_1 = arith.constant 0 : i32
    return %c0_i32, %c0_i32_0 : i32, i32
  }
  func.func @transform_2(%arg0: i32) -> (i32, i32) {
    %c0_i32 = arith.constant 0 : i32
    %c0_i32_0 = arith.constant 0 : i32
    %c0_i32_1 = arith.constant 0 : i32
    return %c0_i32, %c0_i32_0 : i32, i32
  }
  func.func @transform_3(%arg0: i32) -> (i32, i32) {
    %c0_i32 = arith.constant 0 : i32
    %c0_i32_0 = arith.constant 0 : i32
    %c0_i32_1 = arith.constant 0 : i32
    return %c0_i32, %c0_i32_0 : i32, i32
  }
  func.func @transform_4(%arg0: i32) -> (i32, i32) {
    %c0_i32 = arith.constant 0 : i32
    %c0_i32_0 = arith.constant 0 : i32
    return %arg0, %c0_i32 : i32, i32
  }
}

</mosaic_0001>

<bundles_post_ra>
// kernel: tpu_custom_call.1
= control target key start
LH: loop header
LB: loop body
LE: loop exit
PB: predicated region body
PF: predicated region fallthrough
CT: control target
= control target key end

     0   :  { %9 = vsyncpa [#allocation3], 0  ;;  %s2513_s0 = inlined_call_operand.hbm [shape: f32[8,10], index: 0, kind: input, shape index: {}]   ;;  %s2514_s1 = inlined_call_operand.hbm [shape: f32[10,1152], index: 1, kind: input, shape index: {}]   ;;  %s2515_s2 = inlined_call_operand.hbm [shape: f32[1152,128], index: 2, kind: input, shape index: {}]   ;;  %s2516_s3 = inlined_call_operand.vmem [shape: f32[1,128], index: 3, kind: input, shape index: {}]   ;;  %s2517_s4 = inlined_call_operand.hbm [shape: f32[8,128], index: 4, kind: output, shape index: {}]  }
   0x1   :  { %10 = vsyncpa [#allocation6], 0 }
   0x2   :  { %11 = vsyncpa [#allocation4], 0  ;;  %s2227_s15 = smov [#allocation5]  }
   0x3   :  { %s27_s16 = sshll.u32 %s2227_s15, 4  ;;  %s28_s16 = int_to_ptr.vmem [resolvable:$true] %s27_s16 }
   0x4   :  { %s2149_s17 = scalar_lea.vmem %s28_s16, 2304  ;;  %p2154_p1 = scmp.lt.s32.totalorder %s28_s16, %s28_s16 }
   0x5   :  { %p2150_p0 = scmp.ne.s32.totalorder %s28_s16, %s2149_s17  ;;  %p2155_p2 = scmp.lt.s32.totalorder %s2149_s17, %s2149_s17 }
   0x7   :  { %p2156_p3 = por %p2155_p2, %p2154_p1 }
   0x9   :  { %p2157_p4 = pnand %p2156_p3, %p2150_p0 }
   0xb   :  { %2160 = shalt.err (!%p2157_p4)
}
   0xc   :  { %s2228_s18 = smov 1152   ;;  %s2229_s19 = smov 72  }
   0xd   :  { %33 = dma.hbm_to_vmem [thread:$0]  %s2514_s1, 2304, %s28_s16, [#allocation6], %s2228_s18, %s2228_s18, %s2229_s19  }
   0xe   :  { %s2230_s22 = smov [#allocation2]   ;;  %s2231_s24 = smov [#allocation7]  }
   0xf   :  { %s18_s23 = sshll.u32 %s2230_s22, 4  ;;  %s39_s25 = sshll.u32 %s2231_s24, 4  ;;  %s19_s23 = int_to_ptr.vmem [resolvable:$true] %s18_s23  ;;  %s40_s25 = int_to_ptr.vmem [resolvable:$true] %s39_s25 }
  0x10   :  { %s2169_s26 = scalar_lea.vmem %s19_s23, 128  ;;  %p2174_p6 = scmp.lt.s32.totalorder %s19_s23, %s19_s23 }
  0x11   :  { %p2170_p5 = scmp.ne.s32.totalorder %s19_s23, %s2169_s26  ;;  %p2175_p7 = scmp.lt.s32.totalorder %s2169_s26, %s2169_s26 }
  0x13   :  { %p2176_p8 = por %p2175_p7, %p2174_p6 }
  0x15   :  { %p2177_p9 = pnand %p2176_p8, %p2170_p5 }
  0x17   :  { %2180 = shalt.err (!%p2177_p9)
}
  0x18   :  { %21 = dma.hbm_to_vmem [thread:$0]  %s2513_s0, 128, %s19_s23, [#allocation3]  }
  0x19   :  { %s2189_s29 = scalar_lea.vmem %s40_s25, 18432  ;;  %p2194_p11 = scmp.lt.s32.totalorder %s40_s25, %s40_s25 }
  0x1a   :  { %p2190_p10 = scmp.ne.s32.totalorder %s40_s25, %s2189_s29  ;;  %p2195_p12 = scmp.lt.s32.totalorder %s2189_s29, %s2189_s29 }
  0x1c   :  { %p2196_p13 = por %p2195_p12, %p2194_p11 }
  0x1e   :  { %p2197_p0 = pnand %p2196_p13, %p2190_p10 }
  0x20   :  { %2200 = shalt.err (!%p2197_p0)
}
  0x21   :  { %s2232_s1 = smov 128   ;;  %s2233_s30 = smov 8  }
  0x22   :  { %45 = dma.hbm_to_vmem [thread:$0]  %s2515_s2, 18432, %s40_s25, [#allocation6], %s2232_s1, %s2232_s1, %s2233_s30  }
  0x23   :  { %2221 = dma.done.wait [#allocation3], 128  }
  0x24   :  { %2222 = vsyncadd [#allocation3], 4294967168 }
  0x25   :  { %2223 = dma.done.wait [#allocation6], 20736  }
  0x26   :  { %2224 = vsyncadd [#allocation6], 4294946560  ;;  %v2234_v0 = vmov 0.0   ;;  %vm2235_vm0 = vmmov 0   ;;  %vm71_vm1 = vcmask 1041408   ;;  %v65_v2 = vld [vmem:[#allocation5] sm:$0xff] }
  0x27   :  { %1753 = vmatprep.subr.mxu0 %v2234_v0  ;;  %1757 = vmatprep.mubr.msk.f32.mxu0 %vm2235_vm0, %v2234_v0  ;;  %v66_v1 = vld [vmem:[#allocation5 + $0x48] sm:$0x3]  ;;  %v2278_v3 = vld [vmem:[#allocation2] sm:$0xff]  ;;  %vm67_vm2 = vcmask 80896   ;;  %v234_v5 = vld [vmem:[#allocation5 + $0x50] sm:$0x3] }
  0x28   :  { %1760 = vmatprep.subr.mxu1 %v2234_v0  ;;  %1792 = vmatprep.mubr.msk.f32.mxu1 %vm2235_vm0, %v2234_v0  ;;  %v161_v4 = vld [vmem:[#allocation7 + $0x78] sm:$0xff]  ;;  %v160_v6 = vld [vmem:[#allocation7 + $0x70] sm:$0xff]  ;;  %v159_v8 = vld [vmem:[#allocation7 + $0x68] sm:$0xff] }
  0x29   :  { %1754 = vmatpush3.msk.msra.mxu0 %vm71_vm1, %v66_v1  ;;  %1761 = vmatpush3.msra.mxu1 %v161_v4  ;;  %v233_v7 = vld [vmem:[#allocation5 + $0x8] sm:$0xff]  ;;  %v158_v10 = vld [vmem:[#allocation7 + $0x60] sm:$0xff]  ;;  %v323_v11 = vld [vmem:[#allocation7 + $0xf0] sm:$0xff] }
  0x2a   :  { %1755 = vmatprep.subr.mxu0 %v2234_v0  ;;  %1762 = vmatprep.subr.mxu1 %v2234_v0  ;;  %v324_v9 = vld [vmem:[#allocation7 + $0xf8] sm:$0xff]  ;;  %v322_v13 = vld [vmem:[#allocation7 + $0xe8] sm:$0xff]  ;;  %v156_v14 = vld [vmem:[#allocation7 + $0x50] sm:$0xff] }
  0x2b   :  { %1756 = vmatpush3.msra.mxu0 %v65_v2  ;;  %1763 = vmatpush3.msra.mxu1 %v160_v6  ;;  %v157_v12 = vld [vmem:[#allocation7 + $0x58] sm:$0xff]  ;;  %v321_v15 = vld [vmem:[#allocation7 + $0xe0] sm:$0xff]  ;;  %v155_v16 = vld [vmem:[#allocation7 + $0x48] sm:$0xff] }
  0x2c   :  { %1758 = vmatmul.mubr.msk.f32.vlgmr.msra.gmra.mxu0 %vm67_vm2, %v2278_v3  ;;  %1795 = vmatprep.subr.mxu0 %v2234_v0  ;;  %v320_v17 = vld [vmem:[#allocation7 + $0xd8] sm:$0xff]  ;;  %v154_v18 = vld [vmem:[#allocation7 + $0x40] sm:$0xff]  ;;  %v319_v19 = vld [vmem:[#allocation7 + $0xd0] sm:$0xff] }
  0x2d   :  { %1796 = vmatpush3.msk.msra.mxu0 %vm71_vm1, %v234_v5  ;;  %1799 = vmatprep.mubr.msk.f32.mxu0 %vm2235_vm0, %v2234_v0  ;;  %v153_v20 = vld [vmem:[#allocation7 + $0x38] sm:$0xff]  ;;  %v318_v21 = vld [vmem:[#allocation7 + $0xc8] sm:$0xff]  ;;  %v152_v22 = vld [vmem:[#allocation7 + $0x30] sm:$0xff] }
  0x2e   :  { %1797 = vmatprep.subr.mxu0 %v2234_v0  ;;  %1764 = vmatprep.subr.mxu1 %v2234_v0  ;;  %v317_v23 = vld [vmem:[#allocation7 + $0xc0] sm:$0xff]  ;;  %v151_v24 = vld [vmem:[#allocation7 + $0x28] sm:$0xff]  ;;  %v316_v25 = vld [vmem:[#allocation7 + $0xb8] sm:$0xff] }
  0x2f   :  { %1798 = vmatpush3.msra.mxu0 %v233_v7  ;;  %1765 = vmatpush3.msra.mxu1 %v159_v8  ;;  %v150_v26 = vld [vmem:[#allocation7 + $0x20] sm:$0xff]  ;;  %v315_v27 = vld [vmem:[#allocation7 + $0xb0] sm:$0xff]  ;;  %v149_v28 = vld [vmem:[#allocation7 + $0x18] sm:$0xff] }
  0x30   :  { %1800 = vmatmul.mubr.msk.f32.vlgmr.msra.gmra.mxu0 %vm67_vm2, %v2278_v3  ;;  %1802 = vmatprep.subr.mxu0 %v2234_v0  ;;  %v314_v29 = vld [vmem:[#allocation7 + $0xa8] sm:$0xff]  ;;  %v148_v30 = vld [vmem:[#allocation7 + $0x10] sm:$0xff]  ;;  %v313_v31 = vld [vmem:[#allocation7 + $0xa0] sm:$0xff] }
  0x31   :  { %1803 = vmatpush3.msra.mxu0 %v324_v9  ;;  %1766 = vmatprep.subr.mxu1 %v2234_v0  ;;  %v147_v32 = vld [vmem:[#allocation7 + $0x8] sm:$0xff]  ;;  %v312_v33 = vld [vmem:[#allocation7 + $0x98] sm:$0xff]  ;;  %v146_v34 = vld [vmem:[#allocation7] sm:$0xff] }
  0x32   :  { %1804 = vmatprep.subr.mxu0 %v2234_v0  ;;  %1767 = vmatpush3.msra.mxu1 %v158_v10  ;;  %v311_v35 = vld [vmem:[#allocation7 + $0x90] sm:$0xff]  ;;  %v310_v36 = vld [vmem:[#allocation7 + $0x88] sm:$0xff]  ;;  %v309_v37 = vld [vmem:[#allocation7 + $0x80] sm:$0xff] }
  0x33   :  { %1805 = vmatpush3.msra.mxu0 %v323_v11  ;;  %1768 = vmatprep.subr.mxu1 %v2234_v0  ;;  %v487_v40 = vld [vmem:[#allocation7 + $0x178] sm:$0xff]  ;;  %v486_v42 = vld [vmem:[#allocation7 + $0x170] sm:$0xff]  ;;  %v397_v45 = vld [vmem:[#allocation5 + $0x58] sm:$0x3] }
  0x34   :  { %1806 = vmatprep.subr.mxu0 %v2234_v0  ;;  %1769 = vmatpush3.msra.mxu1 %v157_v12  ;;  %v485_v47 = vld [vmem:[#allocation7 + $0x168] sm:$0xff]  ;;  %v396_v48 = vld [vmem:[#allocation5 + $0x10] sm:$0xff]  ;;  %v560_v49 = vld [vmem:[#allocation5 + $0x60] sm:$0x3] }
  0x35   :  { %1807 = vmatpush3.msra.mxu0 %v322_v13  ;;  %1770 = vmatprep.subr.mxu1 %v2234_v0  ;;  %v484_v50 = vld [vmem:[#allocation7 + $0x160] sm:$0xff]  ;;  %v559_v51 = vld [vmem:[#allocation5 + $0x18] sm:$0xff]  ;;  %v650_v52 = vld [vmem:[#allocation7 + $0x1f8] sm:$0xff] }
  0x36   :  { %1808 = vmatprep.subr.mxu0 %v2234_v0  ;;  %1771 = vmatpush3.msra.mxu1 %v156_v14  ;;  %v483_v53 = vld [vmem:[#allocation7 + $0x158] sm:$0xff]  ;;  %v649_v54 = vld [vmem:[#allocation7 + $0x1f0] sm:$0xff]  ;;  %v648_v56 = vld [vmem:[#allocation7 + $0x1e8] sm:$0xff] }
  0x37   :  { %1809 = vmatpush3.msra.mxu0 %v321_v15  ;;  %1772 = vmatprep.subr.mxu1 %v2234_v0  ;;  %v482_v55 = vld [vmem:[#allocation7 + $0x150] sm:$0xff]  ;;  %v481_v57 = vld [vmem:[#allocation7 + $0x148] sm:$0xff]  ;;  %v647_v58 = vld [vmem:[#allocation7 + $0x1e0] sm:$0xff] }
  0x38   :  { %1810 = vmatprep.subr.mxu0 %v2234_v0  ;;  %1773 = vmatpush3.msra.mxu1 %v155_v16  ;;  %v480_v59 = vld [vmem:[#allocation7 + $0x140] sm:$0xff]  ;;  %v646_v60 = vld [vmem:[#allocation7 + $0x1d8] sm:$0xff]  ;;  %v645_v62 = vld [vmem:[#allocation7 + $0x1d0] sm:$0xff] }
  0x39   :  { %1811 = vmatpush3.msra.mxu0 %v320_v17  ;;  %1774 = vmatprep.subr.mxu1 %v2234_v0  ;;  %v479_v61 = vld [vmem:[#allocation7 + $0x138] sm:$0xff]  ;;  %v478_v63 = vld [vmem:[#allocation7 + $0x130] sm:$0xff]  ;;  %v644_v1 = vld [vmem:[#allocation7 + $0x1c8] sm:$0xff] }
  0x3a   :  { %1812 = vmatprep.subr.mxu0 %v2234_v0  ;;  %1775 = vmatpush3.msra.mxu1 %v154_v18  ;;  %v643_v2 = vld [vmem:[#allocation7 + $0x1c0] sm:$0xff]  ;;  %v477_v4 = vld [vmem:[#allocation7 + $0x128] sm:$0xff]  ;;  %v642_v5 = vld [vmem:[#allocation7 + $0x1b8] sm:$0xff] }
  0x3b   :  { %1813 = vmatpush3.msra.mxu0 %v319_v19  ;;  %1776 = vmatprep.subr.mxu1 %v2234_v0  ;;  %v476_v6 = vld [vmem:[#allocation7 + $0x120] sm:$0xff]  ;;  %v641_v7 = vld [vmem:[#allocation7 + $0x1b0] sm:$0xff]  ;;  %v475_v8 = vld [vmem:[#allocation7 + $0x118] sm:$0xff] }
  0x3c   :  { %1814 = vmatprep.subr.mxu0 %v2234_v0  ;;  %1777 = vmatpush3.msra.mxu1 %v153_v20  ;;  %v640_v9 = vld [vmem:[#allocation7 + $0x1a8] sm:$0xff]  ;;  %v474_v10 = vld [vmem:[#allocation7 + $0x110] sm:$0xff]  ;;  %v639_v11 = vld [vmem:[#allocation7 + $0x1a0] sm:$0xff] }
  0x3d   :  { %1815 = vmatpush3.msra.mxu0 %v318_v21  ;;  %1778 = vmatprep.subr.mxu1 %v2234_v0  ;;  %v473_v12 = vld [vmem:[#allocation7 + $0x108] sm:$0xff]  ;;  %v638_v13 = vld [vmem:[#allocation7 + $0x198] sm:$0xff]  ;;  %v472_v14 = vld [vmem:[#allocation7 + $0x100] sm:$0xff] }
  0x3e   :  { %1816 = vmatprep.subr.mxu0 %v2234_v0  ;;  %1779 = vmatpush3.msra.mxu1 %v152_v22  ;;  %v637_v15 = vld [vmem:[#allocation7 + $0x190] sm:$0xff]  ;;  %v636_v16 = vld [vmem:[#allocation7 + $0x188] sm:$0xff]  ;;  %v635_v17 = vld [vmem:[#allocation7 + $0x180] sm:$0xff] }
  0x3f   :  { %1817 = vmatpush3.msra.mxu0 %v317_v23  ;;  %1780 = vmatprep.subr.mxu1 %v2234_v0  ;;  %v1554_v18 = vld [vmem:[%s2516_s3] ss:$0 sm:$0xff]  ;;  %s2236_s3 = smov [#allocation8]  }
  0x40   :  { %1818 = vmatprep.subr.mxu0 %v2234_v0  ;;  %1781 = vmatpush3.msra.mxu1 %v151_v24  ;;  %s1544_s7 = sshll.u32 %s2236_s3, 4  ;;  %s1545_s7 = int_to_ptr.vmem [resolvable:$true] %s1544_s7 }
  0x41   :  { %1819 = vmatpush3.msra.mxu0 %v316_v25  ;;  %1782 = vmatprep.subr.mxu1 %v2234_v0  ;;  %s2201_s8 = scalar_lea.vmem %s1545_s7, 128  ;;  %p2206_p2 = scmp.lt.s32.totalorder %s1545_s7, %s1545_s7 }
  0x42   :  { %1820 = vmatprep.subr.mxu0 %v2234_v0  ;;  %1783 = vmatpush3.msra.mxu1 %v150_v26  ;;  %p2202_p1 = scmp.ne.s32.totalorder %s1545_s7, %s2201_s8  ;;  %p2207_p3 = scmp.lt.s32.totalorder %s2201_s8, %s2201_s8 }
  0x43   :  { %1821 = vmatpush3.msra.mxu0 %v315_v27  ;;  %1784 = vmatprep.subr.mxu1 %v2234_v0  ;;  %v813_v27 = vld [vmem:[#allocation7 + $0x278] sm:$0xff] }
  0x44   :  { %1822 = vmatprep.subr.mxu0 %v2234_v0  ;;  %1785 = vmatpush3.msra.mxu1 %v149_v28  ;;  %p2208_p4 = por %p2207_p3, %p2206_p2 }
  0x45   :  { %1823 = vmatpush3.msra.mxu0 %v314_v29  ;;  %1786 = vmatprep.subr.mxu1 %v2234_v0  ;;  %v812_v29 = vld [vmem:[#allocation7 + $0x270] sm:$0xff] }
  0x46   :  { %1824 = vmatprep.subr.mxu0 %v2234_v0  ;;  %1787 = vmatpush3.msra.mxu1 %v148_v30  ;;  %p2209_p5 = pnand %p2208_p4, %p2202_p1 }
  0x47   :  { %1825 = vmatpush3.msra.mxu0 %v313_v31  ;;  %1788 = vmatprep.subr.mxu1 %v2234_v0 }
  0x48   :  { %1826 = vmatprep.subr.mxu0 %v2234_v0  ;;  %1834 = vmatprep.mubr.msk.f32.mxu0 %vm2235_vm0, %v2234_v0 }
  0x49   :  { %1789 = vmatpush3.msra.mxu1 %v147_v32  ;;  %1827 = vmatpush3.msra.mxu0 %v312_v33  ;;  %v723_v32 = vld [vmem:[#allocation5 + $0x68] sm:$0x3] }
  0x4a   :  { %1790 = vmatprep.subr.mxu1 %v2234_v0  ;;  %1828 = vmatprep.subr.mxu0 %v2234_v0 }
  0x4b   :  { %1791 = vmatpush3.msra.mxu1 %v146_v34  ;;  %1829 = vmatpush3.msra.mxu0 %v311_v35  ;;  %v811_v34 = vld [vmem:[#allocation7 + $0x268] sm:$0xff]  ;;  %v722_v35 = vld [vmem:[#allocation5 + $0x20] sm:$0xff] }
  0x4c   :  { %1830 = vmatprep.subr.mxu0 %v2234_v0  ;;  %1844 = vmatprep.subr.mxu1 %v2234_v0 }
  0x4d   :  { %1831 = vmatpush3.msra.mxu0 %v310_v36  ;;  %v886_v36 = vld [vmem:[#allocation5 + $0x70] sm:$0x3] }
  0x4e   :  { %1832 = vmatprep.subr.mxu0 %v2234_v0 }
  0x4f   :  { %1833 = vmatpush3.msra.mxu0 %v309_v37  ;;  %v810_v37 = vld [vmem:[#allocation7 + $0x260] sm:$0xff] }
  0x50   :  { %1837 = vmatprep.subr.mxu0 %v2234_v0 }
  0xec   :  { %v141_v38 = vpop.f32.mrf.mxu0 }
  0xed   :  { %v145_v39 = vmax.f32 %v141_v38, 0.0  ;;  %v885_v38 = vld [vmem:[#allocation5 + $0x28] sm:$0xff] }
  0xee   :  { %v1759_v41 = vpop.f32.mrf.mxu0 }
  0xef   :  { %1793 = vmatmul.mubr.f32.vlgmr.msra.gmra.mxu1 %v145_v39  ;;  %v976_v39 = vld [vmem:[#allocation7 + $0x2f8] sm:$0xff]  ;;  %v975_v41 = vld [vmem:[#allocation7 + $0x2f0] sm:$0xff] }
  0xf0   :  { %v304_v43 = vpop.f32.mrf.mxu0  ;;  %1845 = vmatpush3.msra.mxu1 %v487_v40  ;;  %1876 = vmatprep.mubr.msk.f32.mxu1 %vm2235_vm0, %v2234_v0  ;;  %v809_v40 = vld [vmem:[#allocation7 + $0x258] sm:$0xff] }
  0xf1   :  { %v308_v44 = vmax.f32 %v304_v43, 0.0  ;;  %1846 = vmatprep.subr.mxu1 %v2234_v0  ;;  %v974_v43 = vld [vmem:[#allocation7 + $0x2e8] sm:$0xff] }
  0xf2   :  { %v1801_v46 = vpop.f32.mrf.mxu0  ;;  %1847 = vmatpush3.msra.mxu1 %v486_v42  ;;  %v808_v42 = vld [vmem:[#allocation7 + $0x250] sm:$0xff] }
  0xf3   :  { %1835 = vmatmul.mubr.f32.vlgmr.msra.gmra.mxu0 %v308_v44  ;;  %1848 = vmatprep.subr.mxu1 %v2234_v0  ;;  %v807_v44 = vld [vmem:[#allocation7 + $0x248] sm:$0xff]  ;;  %v806_v46 = vld [vmem:[#allocation7 + $0x240] sm:$0xff] }
  0xf4   :  { %1838 = vmatpush3.msk.msra.mxu0 %vm71_vm1, %v397_v45  ;;  %1841 = vmatprep.mubr.msk.f32.mxu0 %vm2235_vm0, %v2234_v0  ;;  %v973_v45 = vld [vmem:[#allocation7 + $0x2e0] sm:$0xff] }
  0xf5   :  { %1839 = vmatprep.subr.mxu0 %v2234_v0  ;;  %1849 = vmatpush3.msra.mxu1 %v485_v47  ;;  %v972_v47 = vld [vmem:[#allocation7 + $0x2d8] sm:$0xff] }
  0xf6   :  { %1840 = vmatpush3.msra.mxu0 %v396_v48  ;;  %1850 = vmatprep.subr.mxu1 %v2234_v0  ;;  %v805_v48 = vld [vmem:[#allocation7 + $0x238] sm:$0xff] }
  0xf7   :  { %1842 = vmatmul.mubr.msk.f32.vlgmr.msra.gmra.mxu0 %vm67_vm2, %v2278_v3  ;;  %1879 = vmatprep.subr.mxu0 %v2234_v0 }
  0xf8   :  { %1880 = vmatpush3.msk.msra.mxu0 %vm71_vm1, %v560_v49  ;;  %1883 = vmatprep.mubr.msk.f32.mxu0 %vm2235_vm0, %v2234_v0  ;;  %v971_v49 = vld [vmem:[#allocation7 + $0x2d0] sm:$0xff] }
  0xf9   :  { %1881 = vmatprep.subr.mxu0 %v2234_v0  ;;  %1851 = vmatpush3.msra.mxu1 %v484_v50  ;;  %v804_v50 = vld [vmem:[#allocation7 + $0x230] sm:$0xff] }
  0xfa   :  { %1882 = vmatpush3.msra.mxu0 %v559_v51  ;;  %1852 = vmatprep.subr.mxu1 %v2234_v0  ;;  %v970_v51 = vld [vmem:[#allocation7 + $0x2c8] sm:$0xff] }
  0xfb   :  { %1884 = vmatmul.mubr.msk.f32.vlgmr.msra.gmra.mxu0 %vm67_vm2, %v2278_v3  ;;  %1886 = vmatprep.subr.mxu0 %v2234_v0 }
  0xfc   :  { %1887 = vmatpush3.msra.mxu0 %v650_v52  ;;  %1853 = vmatpush3.msra.mxu1 %v483_v53  ;;  %v969_v52 = vld [vmem:[#allocation7 + $0x2c0] sm:$0xff]  ;;  %v803_v53 = vld [vmem:[#allocation7 + $0x228] sm:$0xff] }
  0xfd   :  { %1888 = vmatprep.subr.mxu0 %v2234_v0  ;;  %1854 = vmatprep.subr.mxu1 %v2234_v0 }
  0xfe   :  { %1889 = vmatpush3.msra.mxu0 %v649_v54  ;;  %1855 = vmatpush3.msra.mxu1 %v482_v55  ;;  %v968_v54 = vld [vmem:[#allocation7 + $0x2b8] sm:$0xff]  ;;  %v802_v55 = vld [vmem:[#allocation7 + $0x220] sm:$0xff] }
  0xff   :  { %1890 = vmatprep.subr.mxu0 %v2234_v0  ;;  %1856 = vmatprep.subr.mxu1 %v2234_v0 }
 0x100   :  { %1891 = vmatpush3.msra.mxu0 %v648_v56  ;;  %1857 = vmatpush3.msra.mxu1 %v481_v57  ;;  %v967_v56 = vld [vmem:[#allocation7 + $0x2b0] sm:$0xff]  ;;  %v801_v57 = vld [vmem:[#allocation7 + $0x218] sm:$0xff] }
 0x101   :  { %1892 = vmatprep.subr.mxu0 %v2234_v0  ;;  %1858 = vmatprep.subr.mxu1 %v2234_v0 }
 0x102   :  { %1893 = vmatpush3.msra.mxu0 %v647_v58  ;;  %1859 = vmatpush3.msra.mxu1 %v480_v59  ;;  %v966_v58 = vld [vmem:[#allocation7 + $0x2a8] sm:$0xff]  ;;  %v800_v59 = vld [vmem:[#allocation7 + $0x210] sm:$0xff] }
 0x103   :  { %1894 = vmatprep.subr.mxu0 %v2234_v0  ;;  %1860 = vmatprep.subr.mxu1 %v2234_v0 }
 0x104   :  { %1895 = vmatpush3.msra.mxu0 %v646_v60  ;;  %1861 = vmatpush3.msra.mxu1 %v479_v61  ;;  %v965_v60 = vld [vmem:[#allocation7 + $0x2a0] sm:$0xff]  ;;  %v799_v61 = vld [vmem:[#allocation7 + $0x208] sm:$0xff] }
 0x105   :  { %1896 = vmatprep.subr.mxu0 %v2234_v0  ;;  %1862 = vmatprep.subr.mxu1 %v2234_v0 }
 0x106   :  { %1897 = vmatpush3.msra.mxu0 %v645_v62  ;;  %1863 = vmatpush3.msra.mxu1 %v478_v63  ;;  %v964_v62 = vld [vmem:[#allocation7 + $0x298] sm:$0xff]  ;;  %v798_v63 = vld [vmem:[#allocation7 + $0x200] sm:$0xff] }
 0x107   :  { %1898 = vmatprep.subr.mxu0 %v2234_v0  ;;  %1864 = vmatprep.subr.mxu1 %v2234_v0 }
 0x108   :  { %1899 = vmatpush3.msra.mxu0 %v644_v1  ;;  %1918 = vmatprep.mubr.msk.f32.mxu0 %vm2235_vm0, %v2234_v0  ;;  %v963_v1 = vld [vmem:[#allocation7 + $0x290] sm:$0xff] }
 0x109   :  { %1900 = vmatprep.subr.mxu0 %v2234_v0  ;;  %1865 = vmatpush3.msra.mxu1 %v477_v4  ;;  %v961_v4 = vld [vmem:[#allocation7 + $0x280] sm:$0xff] }
 0x10a   :  { %1901 = vmatpush3.msra.mxu0 %v643_v2  ;;  %1866 = vmatprep.subr.mxu1 %v2234_v0  ;;  %v962_v2 = vld [vmem:[#allocation7 + $0x288] sm:$0xff] }
 0x10b   :  { %1902 = vmatprep.subr.mxu0 %v2234_v0  ;;  %1867 = vmatpush3.msra.mxu1 %v476_v6 }
 0x10c   :  { %1903 = vmatpush3.msra.mxu0 %v642_v5  ;;  %1868 = vmatprep.subr.mxu1 %v2234_v0 }
 0x10d   :  { %1904 = vmatprep.subr.mxu0 %v2234_v0  ;;  %1869 = vmatpush3.msra.mxu1 %v475_v8 }
 0x10e   :  { %1905 = vmatpush3.msra.mxu0 %v641_v7  ;;  %1870 = vmatprep.subr.mxu1 %v2234_v0 }
 0x10f   :  { %1906 = vmatprep.subr.mxu0 %v2234_v0  ;;  %1871 = vmatpush3.msra.mxu1 %v474_v10 }
 0x110   :  { %1907 = vmatpush3.msra.mxu0 %v640_v9  ;;  %1872 = vmatprep.subr.mxu1 %v2234_v0 }
 0x111   :  { %1908 = vmatprep.subr.mxu0 %v2234_v0  ;;  %1873 = vmatpush3.msra.mxu1 %v473_v12 }
 0x112   :  { %1909 = vmatpush3.msra.mxu0 %v639_v11  ;;  %1874 = vmatprep.subr.mxu1 %v2234_v0 }
 0x113   :  { %1910 = vmatprep.subr.mxu0 %v2234_v0  ;;  %1875 = vmatpush3.msra.mxu1 %v472_v14 }
 0x114   :  { %1911 = vmatpush3.msra.mxu0 %v638_v13  ;;  %1928 = vmatprep.subr.mxu1 %v2234_v0  ;;  %v1139_v13 = vld [vmem:[#allocation7 + $0x378] sm:$0xff] }
 0x115   :  { %1912 = vmatprep.subr.mxu0 %v2234_v0 }
 0x116   :  { %1913 = vmatpush3.msra.mxu0 %v637_v15  ;;  %v1138_v15 = vld [vmem:[#allocation7 + $0x370] sm:$0xff] }
 0x117   :  { %1914 = vmatprep.subr.mxu0 %v2234_v0 }
 0x118   :  { %1915 = vmatpush3.msra.mxu0 %v636_v16 }
 0x119   :  { %1916 = vmatprep.subr.mxu0 %v2234_v0 }
 0x11a   :  { %1917 = vmatpush3.msra.mxu0 %v635_v17 }
 0x11b   :  { %1921 = vmatprep.subr.mxu0 %v2234_v0 }
 0x1af   :  { %v228_v19 = vpop.f32.mrf.mxu1 }
 0x1b0   :  { %v232_v21 = vadd.f32 %v1554_v18, %v228_v19  ;;  %v1049_v18 = vld [vmem:[#allocation5 + $0x78] sm:$0x3] }
 0x1b1   :  { %v1794_v20 = vpop.f32.mrf.mxu1 }
 0x1b2   :  { %v1137_v20 = vld [vmem:[#allocation7 + $0x368] sm:$0xff] }
 0x1b3   :  { %v391_v22 = vpop.f32.mrf.mxu0 }
 0x1b4   :  { %v2378_v23 = vadd.f32 %v391_v22, %v232_v21  ;;  %v1048_v21 = vld [vmem:[#allocation5 + $0x30] sm:$0xff]  ;;  %v1212_v22 = vld [vmem:[#allocation5 + $0x80] sm:$0x3] }
 0x1b5   :  { %v1836_v24 = vpop.f32.mrf.mxu0 }
 0x1b6   :  { %v1211_v24 = vld [vmem:[#allocation5 + $0x38] sm:$0xff] }
 0x1b7   :  { %v467_v25 = vpop.f32.mrf.mxu0 }
 0x1b8   :  { %v471_v26 = vmax.f32 %v467_v25, 0.0  ;;  %v1302_v25 = vld [vmem:[#allocation7 + $0x3f8] sm:$0xff] }
 0x1b9   :  { %v1843_v28 = vpop.f32.mrf.mxu0 }
 0x1ba   :  { %1877 = vmatmul.mubr.f32.vlgmr.msra.gmra.mxu1 %v471_v26  ;;  %v1135_v26 = vld [vmem:[#allocation7 + $0x358] sm:$0xff]  ;;  %v1134_v28 = vld [vmem:[#allocation7 + $0x350] sm:$0xff] }
 0x1bb   :  { %v630_v30 = vpop.f32.mrf.mxu0  ;;  %1929 = vmatpush3.msra.mxu1 %v813_v27  ;;  %1960 = vmatprep.mubr.msk.f32.mxu1 %vm2235_vm0, %v2234_v0  ;;  %v1301_v27 = vld [vmem:[#allocation7 + $0x3f0] sm:$0xff] }
 0x1bc   :  { %v634_v31 = vmax.f32 %v630_v30, 0.0  ;;  %1930 = vmatprep.subr.mxu1 %v2234_v0  ;;  %v1133_v30 = vld [vmem:[#allocation7 + $0x348] sm:$0xff] }
 0x1bd   :  { %v1885_v33 = vpop.f32.mrf.mxu0  ;;  %1931 = vmatpush3.msra.mxu1 %v812_v29  ;;  %v1300_v29 = vld [vmem:[#allocation7 + $0x3e8] sm:$0xff] }
 0x1be   :  { %1919 = vmatmul.mubr.f32.vlgmr.msra.gmra.mxu0 %v634_v31  ;;  %1932 = vmatprep.subr.mxu1 %v2234_v0  ;;  %v1299_v31 = vld [vmem:[#allocation7 + $0x3e0] sm:$0xff]  ;;  %v1298_v33 = vld [vmem:[#allocation7 + $0x3d8] sm:$0xff] }
 0x1bf   :  { %1922 = vmatpush3.msk.msra.mxu0 %vm71_vm1, %v723_v32  ;;  %1925 = vmatprep.mubr.msk.f32.mxu0 %vm2235_vm0, %v2234_v0  ;;  %v1132_v32 = vld [vmem:[#allocation7 + $0x340] sm:$0xff] }
 0x1c0   :  { %1923 = vmatprep.subr.mxu0 %v2234_v0  ;;  %1933 = vmatpush3.msra.mxu1 %v811_v34  ;;  %v1131_v34 = vld [vmem:[#allocation7 + $0x338] sm:$0xff] }
 0x1c1   :  { %1924 = vmatpush3.msra.mxu0 %v722_v35  ;;  %1934 = vmatprep.subr.mxu1 %v2234_v0  ;;  %v1297_v35 = vld [vmem:[#allocation7 + $0x3d0] sm:$0xff] }
 0x1c2   :  { %1926 = vmatmul.mubr.msk.f32.vlgmr.msra.gmra.mxu0 %vm67_vm2, %v2278_v3  ;;  %1963 = vmatprep.subr.mxu0 %v2234_v0 }
 0x1c3   :  { %1964 = vmatpush3.msk.msra.mxu0 %vm71_vm1, %v886_v36  ;;  %1967 = vmatprep.mubr.msk.f32.mxu0 %vm2235_vm0, %v2234_v0  ;;  %v1130_v36 = vld [vmem:[#allocation7 + $0x330] sm:$0xff] }
 0x1c4   :  { %1965 = vmatprep.subr.mxu0 %v2234_v0  ;;  %1935 = vmatpush3.msra.mxu1 %v810_v37  ;;  %v1296_v37 = vld [vmem:[#allocation7 + $0x3c8] sm:$0xff] }
 0x1c5   :  { %1966 = vmatpush3.msra.mxu0 %v885_v38  ;;  %1936 = vmatprep.subr.mxu1 %v2234_v0  ;;  %v1295_v38 = vld [vmem:[#allocation7 + $0x3c0] sm:$0xff] }
 0x1c6   :  { %1968 = vmatmul.mubr.msk.f32.vlgmr.msra.gmra.mxu0 %vm67_vm2, %v2278_v3  ;;  %1970 = vmatprep.subr.mxu0 %v2234_v0 }
 0x1c7   :  { %1971 = vmatpush3.msra.mxu0 %v976_v39  ;;  %1937 = vmatpush3.msra.mxu1 %v809_v40  ;;  %v1129_v39 = vld [vmem:[#allocation7 + $0x328] sm:$0xff]  ;;  %v1294_v40 = vld [vmem:[#allocation7 + $0x3b8] sm:$0xff] }
 0x1c8   :  { %1972 = vmatprep.subr.mxu0 %v2234_v0  ;;  %1938 = vmatprep.subr.mxu1 %v2234_v0 }
 0x1c9   :  { %1973 = vmatpush3.msra.mxu0 %v975_v41  ;;  %1939 = vmatpush3.msra.mxu1 %v808_v42  ;;  %v1128_v41 = vld [vmem:[#allocation7 + $0x320] sm:$0xff]  ;;  %v1293_v42 = vld [vmem:[#allocation7 + $0x3b0] sm:$0xff] }
 0x1ca   :  { %1974 = vmatprep.subr.mxu0 %v2234_v0  ;;  %1940 = vmatprep.subr.mxu1 %v2234_v0 }
 0x1cb   :  { %1975 = vmatpush3.msra.mxu0 %v974_v43  ;;  %1941 = vmatpush3.msra.mxu1 %v807_v44  ;;  %v1127_v43 = vld [vmem:[#allocation7 + $0x318] sm:$0xff]  ;;  %v1292_v44 = vld [vmem:[#allocation7 + $0x3a8] sm:$0xff] }
 0x1cc   :  { %1976 = vmatprep.subr.mxu0 %v2234_v0  ;;  %1942 = vmatprep.subr.mxu1 %v2234_v0 }
 0x1cd   :  { %1977 = vmatpush3.msra.mxu0 %v973_v45  ;;  %1943 = vmatpush3.msra.mxu1 %v806_v46  ;;  %v1126_v45 = vld [vmem:[#allocation7 + $0x310] sm:$0xff]  ;;  %v1291_v46 = vld [vmem:[#allocation7 + $0x3a0] sm:$0xff] }
 0x1ce   :  { %1978 = vmatprep.subr.mxu0 %v2234_v0  ;;  %1944 = vmatprep.subr.mxu1 %v2234_v0 }
 0x1cf   :  { %1979 = vmatpush3.msra.mxu0 %v972_v47  ;;  %1945 = vmatpush3.msra.mxu1 %v805_v48  ;;  %v1125_v47 = vld [vmem:[#allocation7 + $0x308] sm:$0xff]  ;;  %v1290_v48 = vld [vmem:[#allocation7 + $0x398] sm:$0xff] }
 0x1d0   :  { %1980 = vmatprep.subr.mxu0 %v2234_v0  ;;  %1946 = vmatprep.subr.mxu1 %v2234_v0 }
 0x1d1   :  { %1981 = vmatpush3.msra.mxu0 %v971_v49  ;;  %1947 = vmatpush3.msra.mxu1 %v804_v50  ;;  %v1124_v49 = vld [vmem:[#allocation7 + $0x300] sm:$0xff]  ;;  %v1289_v50 = vld [vmem:[#allocation7 + $0x390] sm:$0xff] }
 0x1d2   :  { %1982 = vmatprep.subr.mxu0 %v2234_v0  ;;  %1948 = vmatprep.subr.mxu1 %v2234_v0 }
 0x1d3   :  { %1983 = vmatpush3.msra.mxu0 %v970_v51  ;;  %2002 = vmatprep.mubr.msk.f32.mxu0 %vm2235_vm0, %v2234_v0  ;;  %v1288_v51 = vld [vmem:[#allocation7 + $0x388] sm:$0xff] }
 0x1d4   :  { %1984 = vmatprep.subr.mxu0 %v2234_v0  ;;  %1949 = vmatpush3.msra.mxu1 %v803_v53 }
 0x1d5   :  { %1985 = vmatpush3.msra.mxu0 %v969_v52  ;;  %1950 = vmatprep.subr.mxu1 %v2234_v0  ;;  %v1287_v52 = vld [vmem:[#allocation7 + $0x380] sm:$0xff] }
 0x1d6   :  { %1986 = vmatprep.subr.mxu0 %v2234_v0  ;;  %1951 = vmatpush3.msra.mxu1 %v802_v55 }
 0x1d7   :  { %1987 = vmatpush3.msra.mxu0 %v968_v54  ;;  %1952 = vmatprep.subr.mxu1 %v2234_v0 }
 0x1d8   :  { %1988 = vmatprep.subr.mxu0 %v2234_v0  ;;  %1953 = vmatpush3.msra.mxu1 %v801_v57 }
 0x1d9   :  { %1989 = vmatpush3.msra.mxu0 %v967_v56  ;;  %1954 = vmatprep.subr.mxu1 %v2234_v0 }
 0x1da   :  { %1990 = vmatprep.subr.mxu0 %v2234_v0  ;;  %1955 = vmatpush3.msra.mxu1 %v800_v59 }
 0x1db   :  { %1991 = vmatpush3.msra.mxu0 %v966_v58  ;;  %1956 = vmatprep.subr.mxu1 %v2234_v0 }
 0x1dc   :  { %1992 = vmatprep.subr.mxu0 %v2234_v0  ;;  %1957 = vmatpush3.msra.mxu1 %v799_v61  ;;  %v1375_v61 = vld [vmem:[#allocation5 + $0x88] sm:$0x3] }
 0x1dd   :  { %1993 = vmatpush3.msra.mxu0 %v965_v60  ;;  %1958 = vmatprep.subr.mxu1 %v2234_v0 }
 0x1de   :  { %1994 = vmatprep.subr.mxu0 %v2234_v0  ;;  %1959 = vmatpush3.msra.mxu1 %v798_v63  ;;  %v1374_v63 = vld [vmem:[#allocation5 + $0x40] sm:$0xff] }
 0x1df   :  { %1995 = vmatpush3.msra.mxu0 %v964_v62  ;;  %2012 = vmatprep.subr.mxu1 %v2234_v0 }
 0x1e0   :  { %1996 = vmatprep.subr.mxu0 %v2234_v0 }
 0x1e1   :  { %1997 = vmatpush3.msra.mxu0 %v963_v1 }
 0x1e2   :  { %1998 = vmatprep.subr.mxu0 %v2234_v0 }
 0x1e3   :  { %1999 = vmatpush3.msra.mxu0 %v962_v2 }
 0x1e4   :  { %2000 = vmatprep.subr.mxu0 %v2234_v0 }
 0x1e5   :  { %2001 = vmatpush3.msra.mxu0 %v961_v4  ;;  %v1465_v4 = vld [vmem:[#allocation7 + $0x478] sm:$0xff] }
 0x1e6   :  { %2005 = vmatprep.subr.mxu0 %v2234_v0 }
 0x27a   :  { %v554_v5 = vpop.f32.mrf.mxu1 }
 0x27b   :  { %v558_v6 = vadd.f32 %v554_v5, %v2378_v23  ;;  %v1136_v23 = vld [vmem:[#allocation7 + $0x360] sm:$0xff] }
 0x27c   :  { %v1878_v7 = vpop.f32.mrf.mxu1 }
 0x27d   :  { %v1463_v7 = vld [vmem:[#allocation7 + $0x468] sm:$0xff] }
 0x27e   :  { %v717_v8 = vpop.f32.mrf.mxu0 }
 0x27f   :  { %v2431_v9 = vadd.f32 %v717_v8, %v558_v6  ;;  %v1464_v6 = vld [vmem:[#allocation7 + $0x470] sm:$0xff]  ;;  %v1462_v8 = vld [vmem:[#allocation7 + $0x460] sm:$0xff] }
 0x280   :  { %v1920_v10 = vpop.f32.mrf.mxu0 }
 0x281   :  { %v1459_v10 = vld [vmem:[#allocation7 + $0x448] sm:$0xff] }
 0x282   :  { %v793_v11 = vpop.f32.mrf.mxu0 }
 0x283   :  { %v797_v12 = vmax.f32 %v793_v11, 0.0  ;;  %v1458_v11 = vld [vmem:[#allocation7 + $0x440] sm:$0xff] }
 0x284   :  { %v1927_v14 = vpop.f32.mrf.mxu0 }
 0x285   :  { %1961 = vmatmul.mubr.f32.vlgmr.msra.gmra.mxu1 %v797_v12  ;;  %v1457_v12 = vld [vmem:[#allocation7 + $0x438] sm:$0xff]  ;;  %v1455_v14 = vld [vmem:[#allocation7 + $0x428] sm:$0xff] }
 0x286   :  { %v956_v16 = vpop.f32.mrf.mxu0  ;;  %2013 = vmatpush3.msra.mxu1 %v1139_v13  ;;  %2044 = vmatprep.mubr.msk.f32.mxu1 %vm2235_vm0, %v2234_v0  ;;  %v1456_v13 = vld [vmem:[#allocation7 + $0x430] sm:$0xff] }
 0x287   :  { %v960_v17 = vmax.f32 %v956_v16, 0.0  ;;  %2014 = vmatprep.subr.mxu1 %v2234_v0  ;;  %v1453_v16 = vld [vmem:[#allocation7 + $0x418] sm:$0xff] }
 0x288   :  { %v1969_v19 = vpop.f32.mrf.mxu0  ;;  %2015 = vmatpush3.msra.mxu1 %v1138_v15  ;;  %v1454_v15 = vld [vmem:[#allocation7 + $0x420] sm:$0xff] }
 0x289   :  { %2003 = vmatmul.mubr.f32.vlgmr.msra.gmra.mxu0 %v960_v17  ;;  %2016 = vmatprep.subr.mxu1 %v2234_v0  ;;  %v1452_v17 = vld [vmem:[#allocation7 + $0x410] sm:$0xff]  ;;  %v1450_v19 = vld [vmem:[#allocation7 + $0x400] sm:$0xff] }
 0x28a   :  { %2006 = vmatpush3.msk.msra.mxu0 %vm71_vm1, %v1049_v18  ;;  %2009 = vmatprep.mubr.msk.f32.mxu0 %vm2235_vm0, %v2234_v0  ;;  %v1451_v18 = vld [vmem:[#allocation7 + $0x408] sm:$0xff] }
 0x28b   :  { %2007 = vmatprep.subr.mxu0 %v2234_v0  ;;  %2017 = vmatpush3.msra.mxu1 %v1137_v20 }
 0x28c   :  { %2008 = vmatpush3.msra.mxu0 %v1048_v21  ;;  %2018 = vmatprep.subr.mxu1 %v2234_v0 }
 0x28d   :  { %2010 = vmatmul.mubr.msk.f32.vlgmr.msra.gmra.mxu0 %vm67_vm2, %v2278_v3  ;;  %2047 = vmatprep.subr.mxu0 %v2234_v0 }
 0x28e   :  { %2048 = vmatpush3.msk.msra.mxu0 %vm71_vm1, %v1212_v22  ;;  %2051 = vmatprep.mubr.msk.f32.mxu0 %vm2235_vm0, %v2234_v0 }
 0x28f   :  { %2049 = vmatprep.subr.mxu0 %v2234_v0  ;;  %2019 = vmatpush3.msra.mxu1 %v1136_v23 }
 0x290   :  { %2050 = vmatpush3.msra.mxu0 %v1211_v24  ;;  %2020 = vmatprep.subr.mxu1 %v2234_v0 }
 0x291   :  { %2052 = vmatmul.mubr.msk.f32.vlgmr.msra.gmra.mxu0 %vm67_vm2, %v2278_v3  ;;  %2054 = vmatprep.subr.mxu0 %v2234_v0 }
 0x292   :  { %2055 = vmatpush3.msra.mxu0 %v1302_v25  ;;  %2021 = vmatpush3.msra.mxu1 %v1135_v26 }
 0x293   :  { %2056 = vmatprep.subr.mxu0 %v2234_v0  ;;  %2022 = vmatprep.subr.mxu1 %v2234_v0 }
 0x294   :  { %2057 = vmatpush3.msra.mxu0 %v1301_v27  ;;  %2023 = vmatpush3.msra.mxu1 %v1134_v28 }
 0x295   :  { %2058 = vmatprep.subr.mxu0 %v2234_v0  ;;  %2024 = vmatprep.subr.mxu1 %v2234_v0 }
 0x296   :  { %2059 = vmatpush3.msra.mxu0 %v1300_v29  ;;  %2025 = vmatpush3.msra.mxu1 %v1133_v30 }
 0x297   :  { %2060 = vmatprep.subr.mxu0 %v2234_v0  ;;  %2026 = vmatprep.subr.mxu1 %v2234_v0 }
 0x298   :  { %2061 = vmatpush3.msra.mxu0 %v1299_v31  ;;  %2027 = vmatpush3.msra.mxu1 %v1132_v32 }
 0x299   :  { %2062 = vmatprep.subr.mxu0 %v2234_v0  ;;  %2028 = vmatprep.subr.mxu1 %v2234_v0 }
 0x29a   :  { %2063 = vmatpush3.msra.mxu0 %v1298_v33  ;;  %2029 = vmatpush3.msra.mxu1 %v1131_v34 }
 0x29b   :  { %2064 = vmatprep.subr.mxu0 %v2234_v0  ;;  %2030 = vmatprep.subr.mxu1 %v2234_v0 }
 0x29c   :  { %2065 = vmatpush3.msra.mxu0 %v1297_v35  ;;  %2031 = vmatpush3.msra.mxu1 %v1130_v36 }
 0x29d   :  { %2066 = vmatprep.subr.mxu0 %v2234_v0  ;;  %2032 = vmatprep.subr.mxu1 %v2234_v0 }
 0x29e   :  { %2067 = vmatpush3.msra.mxu0 %v1296_v37  ;;  %2086 = vmatprep.mubr.msk.f32.mxu0 %vm2235_vm0, %v2234_v0 }
 0x29f   :  { %2068 = vmatprep.subr.mxu0 %v2234_v0  ;;  %2033 = vmatpush3.msra.mxu1 %v1129_v39 }
 0x2a0   :  { %2069 = vmatpush3.msra.mxu0 %v1295_v38  ;;  %2034 = vmatprep.subr.mxu1 %v2234_v0 }
 0x2a1   :  { %2070 = vmatprep.subr.mxu0 %v2234_v0  ;;  %2035 = vmatpush3.msra.mxu1 %v1128_v41 }
 0x2a2   :  { %2071 = vmatpush3.msra.mxu0 %v1294_v40  ;;  %2036 = vmatprep.subr.mxu1 %v2234_v0 }
 0x2a3   :  { %2072 = vmatprep.subr.mxu0 %v2234_v0  ;;  %2037 = vmatpush3.msra.mxu1 %v1127_v43 }
 0x2a4   :  { %2073 = vmatpush3.msra.mxu0 %v1293_v42  ;;  %2038 = vmatprep.subr.mxu1 %v2234_v0 }
 0x2a5   :  { %2074 = vmatprep.subr.mxu0 %v2234_v0  ;;  %2039 = vmatpush3.msra.mxu1 %v1126_v45 }
 0x2a6   :  { %2075 = vmatpush3.msra.mxu0 %v1292_v44  ;;  %2040 = vmatprep.subr.mxu1 %v2234_v0 }
 0x2a7   :  { %2076 = vmatprep.subr.mxu0 %v2234_v0  ;;  %2041 = vmatpush3.msra.mxu1 %v1125_v47 }
 0x2a8   :  { %2077 = vmatpush3.msra.mxu0 %v1291_v46  ;;  %2042 = vmatprep.subr.mxu1 %v2234_v0 }
 0x2a9   :  { %2078 = vmatprep.subr.mxu0 %v2234_v0  ;;  %2043 = vmatpush3.msra.mxu1 %v1124_v49 }
 0x2aa   :  { %2079 = vmatpush3.msra.mxu0 %v1290_v48  ;;  %2089 = vmatprep.subr.mxu1 %v2234_v0 }
 0x2ab   :  { %2080 = vmatprep.subr.mxu0 %v2234_v0 }
 0x2ac   :  { %2081 = vmatpush3.msra.mxu0 %v1289_v50 }
 0x2ad   :  { %2082 = vmatprep.subr.mxu0 %v2234_v0 }
 0x2ae   :  { %2083 = vmatpush3.msra.mxu0 %v1288_v51 }
 0x2af   :  { %2084 = vmatprep.subr.mxu0 %v2234_v0 }
 0x2b0   :  { %2085 = vmatpush3.msra.mxu0 %v1287_v52 }
 0x345   :  { %v880_v53 = vpop.f32.mrf.mxu1 }
 0x346   :  { %v884_v54 = vadd.f32 %v880_v53, %v2431_v9  ;;  %v1461_v9 = vld [vmem:[#allocation7 + $0x458] sm:$0xff] }
 0x347   :  { %v1962_v55 = vpop.f32.mrf.mxu1 }
 0x349   :  { %v1043_v56 = vpop.f32.mrf.mxu0 }
 0x34a   :  { %v2483_v57 = vadd.f32 %v1043_v56, %v884_v54 }
 0x34b   :  { %v2004_v58 = vpop.f32.mrf.mxu0 }
 0x34d   :  { %v1119_v59 = vpop.f32.mrf.mxu0 }
 0x34e   :  { %v1123_v60 = vmax.f32 %v1119_v59, 0.0 }
 0x34f   :  { %v2011_v62 = vpop.f32.mrf.mxu0 }
 0x350   :  { %2045 = vmatmul.mubr.f32.vlgmr.msra.gmra.mxu1 %v1123_v60 }
 0x351   :  { %v1282_v1 = vpop.f32.mrf.mxu0  ;;  %2090 = vmatpush3.msk.msra.mxu1 %vm71_vm1, %v1375_v61  ;;  %2093 = vmatprep.mubr.msk.f32.mxu1 %vm2235_vm0, %v2234_v0 }
 0x352   :  { %v1286_v2 = vmax.f32 %v1282_v1, 0.0  ;;  %2091 = vmatprep.subr.mxu1 %v2234_v0 }
 0x353   :  { %2092 = vmatpush3.msra.mxu1 %v1374_v63  ;;  %v2053_v5 = vpop.f32.mrf.mxu0 }
 0x354   :  { %2087 = vmatmul.mubr.f32.vlgmr.msra.gmra.mxu0 %v1286_v2  ;;  %2094 = vmatmul.mubr.msk.f32.vlgmr.msra.gmra.mxu1 %vm67_vm2, %v2278_v3  ;;  %v1460_v3 = vld [vmem:[#allocation7 + $0x450] sm:$0xff] }
 0x355   :  { %2096 = vmatprep.subr.mxu1 %v2234_v0  ;;  %2128 = vmatprep.mubr.msk.f32.mxu1 %vm2235_vm0, %v2234_v0 }
 0x356   :  { %2097 = vmatpush3.msra.mxu1 %v1465_v4 }
 0x357   :  { %2098 = vmatprep.subr.mxu1 %v2234_v0 }
 0x358   :  { %2099 = vmatpush3.msra.mxu1 %v1464_v6 }
 0x359   :  { %2100 = vmatprep.subr.mxu1 %v2234_v0 }
 0x35a   :  { %2101 = vmatpush3.msra.mxu1 %v1463_v7 }
 0x35b   :  { %2102 = vmatprep.subr.mxu1 %v2234_v0 }
 0x35c   :  { %2103 = vmatpush3.msra.mxu1 %v1462_v8 }
 0x35d   :  { %2104 = vmatprep.subr.mxu1 %v2234_v0 }
 0x35e   :  { %2105 = vmatpush3.msra.mxu1 %v1461_v9 }
 0x35f   :  { %2106 = vmatprep.subr.mxu1 %v2234_v0 }
 0x360   :  { %2107 = vmatpush3.msra.mxu1 %v1460_v3 }
 0x361   :  { %2108 = vmatprep.subr.mxu1 %v2234_v0 }
 0x362   :  { %2109 = vmatpush3.msra.mxu1 %v1459_v10 }
 0x363   :  { %2110 = vmatprep.subr.mxu1 %v2234_v0 }
 0x364   :  { %2111 = vmatpush3.msra.mxu1 %v1458_v11 }
 0x365   :  { %2112 = vmatprep.subr.mxu1 %v2234_v0 }
 0x366   :  { %2113 = vmatpush3.msra.mxu1 %v1457_v12 }
 0x367   :  { %2114 = vmatprep.subr.mxu1 %v2234_v0 }
 0x368   :  { %2115 = vmatpush3.msra.mxu1 %v1456_v13 }
 0x369   :  { %2116 = vmatprep.subr.mxu1 %v2234_v0 }
 0x36a   :  { %2117 = vmatpush3.msra.mxu1 %v1455_v14 }
 0x36b   :  { %2118 = vmatprep.subr.mxu1 %v2234_v0 }
 0x36c   :  { %2119 = vmatpush3.msra.mxu1 %v1454_v15 }
 0x36d   :  { %2120 = vmatprep.subr.mxu1 %v2234_v0 }
 0x36e   :  { %2121 = vmatpush3.msra.mxu1 %v1453_v16 }
 0x36f   :  { %2122 = vmatprep.subr.mxu1 %v2234_v0 }
 0x370   :  { %2123 = vmatpush3.msra.mxu1 %v1452_v17 }
 0x371   :  { %2124 = vmatprep.subr.mxu1 %v2234_v0 }
 0x372   :  { %2125 = vmatpush3.msra.mxu1 %v1451_v18 }
 0x373   :  { %2126 = vmatprep.subr.mxu1 %v2234_v0 }
 0x374   :  { %2127 = vmatpush3.msra.mxu1 %v1450_v19 }
 0x410   :  { %v1206_v20 = vpop.f32.mrf.mxu1 }
 0x411   :  { %v1210_v21 = vadd.f32 %v1206_v20, %v2483_v57 }
 0x412   :  { %v2046_v22 = vpop.f32.mrf.mxu1 }
 0x414   :  { %v1369_v23 = vpop.f32.mrf.mxu0  ;;  %v1445_v24 = vpop.f32.mrf.mxu1 }
 0x415   :  { %v1373_v25 = vadd.f32 %v1369_v23, %v1210_v21  ;;  %v1449_v26 = vmax.f32 %v1445_v24, 0.0 }
 0x416   :  { %v2095_v27 = vpop.f32.mrf.mxu1  ;;  %v2088_v28 = vpop.f32.mrf.mxu0 }
 0x417   :  { %2129 = vmatmul.mubr.f32.vlgmr.msra.gmra.mxu1 %v1449_v26 }
 0x4d7   :  { %v1532_v29 = vpop.f32.mrf.mxu1 }
 0x4d8   :  { %v1536_v30 = vadd.f32 %v1532_v29, %v1373_v25 }
 0x4d9   :  { %v2130_v31 = vpop.f32.mrf.mxu1 }
 0x4da   :  { %1537 = vst [vmem:[#allocation8] sm:$0xff] %v1536_v30 }
 0x4db   :  { %2212 = shalt.err (!%p2209_p5)
}
 0x4dc   :  { %1547 = dma.vmem_to_hbm [thread:$0]  %s1545_s7, 128, %s2517_s4, [#allocation4]  }
 0x4dd   :  { %2225 = dma.done.wait [#allocation4], 128  }
 0x4de   :  { %2226 = vsyncadd [#allocation4], 4294967168 }
 0x4df   :  { %1551 = vsyncpa [#allocation3], 1 }
 0x4e0   :  { %1552 = vsyncpa [#allocation6], 1 }
 0x4e1   :  { %1553 = vsyncpa [#allocation4], 1 }

</bundles_post_ra>
